<compile_context>
chip_gen: v5e
topology: v5e:2x2
jax: 0.10.0
libtpu: 0.0.40
codegen_flags: <defaults>
</compile_context>

<pallas_src>
import functools
import math

import jax
import jax.numpy as jnp
from jax.experimental import pallas as pl
from jax.experimental.pallas import tpu as pltpu


def _round_up(x, m):
    return ((x + m - 1) // m) * m


def _pick_wave(t):
    """Largest of 64/32/16/8 that divides the token block size."""
    for w in (64, 32, 16, 8):
        if t % w == 0:
            return w
    return 8


def _vmem_capacity_bytes():
    """Physical VMEM per core; conservative fallback if the query fails."""
    try:
        info = pltpu.get_tpu_info()
        cap = getattr(info, "vmem_capacity_bytes", None)
        if cap:
            return int(cap)
    except Exception:
        pass
    return 64 << 20  # v7x-sized conservative default


# ---------------------------------------------------------------------------
# Path 1: table stays in HBM; rows gathered straight into out_ref via DMA.
# ---------------------------------------------------------------------------
def _gather_hbm_kernel(ids_ref, table_hbm, out_ref, sems, *,
                       tokens_per_block, wave, scale):
    """One grid step embeds `tokens_per_block` tokens.

    ids_ref   : SMEM (N_pad,) int32  -- all token ids (scalar prefetch)
    table_hbm : HBM  (V, D)          -- embedding table (memory_space=pl.ANY)
    out_ref   : VMEM (T, D)          -- output block; DMA destination
    sems      : DMA semaphores (T // wave,) -- one per wave of `wave` rows
    """
    i = pl.program_id(0)
    base = i * tokens_per_block
    n_waves = tokens_per_block // wave

    # Phase 1: issue every row gather for this block up front (destinations
    # are disjoint rows of out_ref); wave w signals sems[w].  Nothing waits
    # yet, so the whole block's bytes are in flight to cover HBM latency.
    for w in range(n_waves):
        for j in range(wave):
            t = w * wave + j
            row = ids_ref[base + t]
            pltpu.make_async_copy(
                table_hbm.at[pl.ds(row, 1)],   # (1, D) row in HBM
                out_ref.at[pl.ds(t, 1)],       # (1, D) row of the output block
                sems.at[w],
            ).start()

    # Phase 2: one wait per wave -- the descriptor's destination is the whole
    # (wave, D) slab, so its byte count matches the sum of the row copies that
    # signalled sems[w] -- then scale that slab in place (f32 math).
    for w in range(n_waves):
        slab = out_ref.at[pl.ds(w * wave, wave)]
        pltpu.make_async_copy(slab, slab, sems.at[w]).wait()
        vals = out_ref[pl.ds(w * wave, wave), :]
        out_ref[pl.ds(w * wave, wave), :] = (
            vals.astype(jnp.float32) * scale).astype(out_ref.dtype)


# ---------------------------------------------------------------------------
# Path 2: whole table VMEM-resident (block-invariant input), dynamic loads.
# ---------------------------------------------------------------------------
def _gather_vmem_kernel(ids_ref, table_ref, out_ref, *, tokens_per_block, scale):
    """ids_ref: SMEM (N_pad,) int32; table_ref: VMEM (V, D); out_ref: VMEM (T, D)."""
    base = pl.program_id(0) * tokens_per_block

    def body(t, carry):
        row = ids_ref[base + t]
        vals = table_ref[pl.ds(row, 1), :]
        out_ref[pl.ds(t, 1), :] = (
            vals.astype(jnp.float32) * scale).astype(out_ref.dtype)
        return carry

    jax.lax.fori_loop(0, tokens_per_block, body, 0, unroll=8)


# ---------------------------------------------------------------------------
# Wrapper
# ---------------------------------------------------------------------------
def input_embedding(ids, table, *, tokens_per_block=512, use_vmem_table=None):
    """Pallas equivalent of InputEmbedding.forward.

    ids:   (B, S) int token ids
    table: (V, D) float embedding weights
    returns (B, S, D) = table[ids] * sqrt(D)
    """
    B, S = ids.shape
    V, D = table.shape
    N = B * S
    itemsize = jnp.dtype(table.dtype).itemsize

    # Token-block size: multiple of 8, large enough to amortize ~0.35us/step
    # pipeline overhead, but capped so the grid keeps >= ~8 steps (2-TC v7x).
    min_steps = 8
    T = _round_up(min(max(tokens_per_block, 8), max(-(-N // min_steps), 8)), 8)
    N_pad = _round_up(N, T)
    n_blocks = N_pad // T

    flat_ids = ids.reshape(N).astype(jnp.int32)
    flat_ids = jnp.clip(flat_ids, 0, V - 1)        # DMA-source bounds safety
    if N_pad != N:
        flat_ids = jnp.concatenate(
            [flat_ids, jnp.zeros((N_pad - N,), jnp.int32)])

    scale = float(math.sqrt(D))

    # Generation-aware fast-path gate: assume the invariant table block may be
    # double-buffered; add the double-buffered (T, D) output block + headroom.
    cap = _vmem_capacity_bytes()
    needed = 2 * V * D * itemsize + 2 * T * D * itemsize + (4 << 20)
    if use_vmem_table is None:
        use_vmem_table = needed <= cap - (24 << 20)

    if use_vmem_table:
        kernel = functools.partial(
            _gather_vmem_kernel, tokens_per_block=T, scale=scale)
        vmem_limit = int(min(max(needed + (8 << 20), 32 << 20), cap))
        out = pl.pallas_call(
            kernel,
            out_shape=jax.ShapeDtypeStruct((N_pad, D), table.dtype),
            grid_spec=pltpu.PrefetchScalarGridSpec(
                num_scalar_prefetch=1,                      # ids -> SMEM
                grid=(n_blocks,),
                in_specs=[
                    # Block-invariant: the table is DMA'd into VMEM once and
                    # reused by every grid step.
                    pl.BlockSpec((V, D), lambda i, ids: (0, 0)),
                ],
                out_specs=pl.BlockSpec((T, D), lambda i, ids: (i, 0)),
            ),
            compiler_params=pltpu.CompilerParams(
                dimension_semantics=("parallel",),
                vmem_limit_bytes=vmem_limit,
            ),
            cost_estimate=pl.CostEstimate(
                flops=N_pad * D,
                transcendentals=0,
                bytes_accessed=V * D * itemsize + N_pad * D * itemsize + N_pad * 4,
            ),
        )(flat_ids, table)
    else:
        wave = _pick_wave(T)
        kernel = functools.partial(
            _gather_hbm_kernel, tokens_per_block=T, wave=wave, scale=scale)
        out = pl.pallas_call(
            kernel,
            out_shape=jax.ShapeDtypeStruct((N_pad, D), table.dtype),
            grid_spec=pltpu.PrefetchScalarGridSpec(
                num_scalar_prefetch=1,                      # ids -> SMEM
                grid=(n_blocks,),
                in_specs=[
                    pl.BlockSpec(memory_space=pl.ANY),      # table stays in HBM
                ],
                out_specs=pl.BlockSpec((T, D), lambda i, ids: (i, 0)),
                scratch_shapes=[
                    pltpu.SemaphoreType.DMA((T // wave,)),  # one sem per wave
                ],
            ),
            compiler_params=pltpu.CompilerParams(
                dimension_semantics=("parallel",),          # disjoint out blocks
            ),
            cost_estimate=pl.CostEstimate(
                flops=N_pad * D,
                transcendentals=0,
                bytes_accessed=2 * N_pad * D * itemsize + N_pad * 4,
            ),
        )(flat_ids, table)

    return out[:N].reshape(B, S, D)


if __name__ == "__main__":
    # Small, deterministic setup consistent with nn.Embedding(vocab_size, d_model).
    vocab_size = 64
    d_model = 128
    batch, seq = 2, 8

    key = jax.random.PRNGKey(0)
    k_tab, k_ids = jax.random.split(key)

    table = jax.random.normal(k_tab, (vocab_size, d_model), dtype=jnp.float32)
    ids = jax.random.randint(k_ids, (batch, seq), 0, vocab_size, dtype=jnp.int32)

    ref = table[ids] * math.sqrt(d_model)

    # Auto path (tiny table -> VMEM-resident fast path).
    out = jax.block_until_ready(input_embedding(ids, table))
    assert out.shape == (batch, seq, d_model)
    assert out.dtype == jnp.float32
    assert jnp.allclose(out, ref, atol=1e-6, rtol=1e-6)

    # Also exercise the HBM row-gather path (used when the table does not fit VMEM).
    out_hbm = jax.block_until_ready(input_embedding(ids, table, use_vmem_table=False))
    assert jnp.allclose(out_hbm, ref, atol=1e-6, rtol=1e-6)

    print("KERNEL_OK")
</pallas_src>

<mosaic_0001>
module attributes {stable_mosaic.version = 11 : i64} {
  func.func @_gather_vmem_kernel(%arg0: i32, %arg1: memref<16xi32, #tpu.memory_space<smem>>, %arg2: memref<64x128xf32, #tpu.memory_space<vmem>>, %arg3: memref<8x128xf32, #tpu.memory_space<vmem>>) attributes {dimension_semantics = [#tpu.dimension_semantics<parallel>], iteration_bounds = array<i64: 2>, scalar_prefetch = 1 : i64, scratch_operands = 0 : i64, tpu.core_type = #tpu.core_type<tc>, window_params = [{pipeline_mode = #tpu.pipeline_mode<synchronous>, transform_indices = @transform_0, window_bounds = array<i64: 64, 128>}, {transform_indices = @transform_1, window_bounds = array<i64: 8, 128>}]} {
    %c8_i32 = arith.constant 8 : i32
    %0 = arith.muli %arg0, %c8_i32 : i32
    %c0_i32 = arith.constant 0 : i32
    %1 = arith.addi %0, %c0_i32 : i32
    %2 = arith.index_cast %1 : i32 to index
    %3 = memref.load %arg1[%2] : memref<16xi32, #tpu.memory_space<smem>>
    %4 = arith.index_cast %3 : i32 to index
    %c0 = arith.constant 0 : index
    %5 = vector.load %arg2[%4, %c0] : memref<64x128xf32, #tpu.memory_space<vmem>>, vector<1x128xf32>
    %cst = arith.constant 11.3137083 : f32
    %6 = vector.broadcast %cst : f32 to vector<1x128xf32>
    %7 = arith.mulf %5, %6 : vector<1x128xf32>
    %8 = arith.index_cast %c0_i32 : i32 to index
    %c0_0 = arith.constant 0 : index
    %9 = vector.load %arg3[%8, %c0_0] : memref<8x128xf32, #tpu.memory_space<vmem>>, vector<1x128xf32>
    tpu.vector_store %arg3[%8, %c0_0], %7 {strides = array<i32>} : memref<8x128xf32, #tpu.memory_space<vmem>>, vector<1x128xf32>,
    %c1_i32 = arith.constant 1 : i32
    %10 = arith.addi %0, %c1_i32 : i32
    %11 = arith.index_cast %10 : i32 to index
    %12 = memref.load %arg1[%11] : memref<16xi32, #tpu.memory_space<smem>>
    %13 = arith.index_cast %12 : i32 to index
    %c0_1 = arith.constant 0 : index
    %14 = vector.load %arg2[%13, %c0_1] : memref<64x128xf32, #tpu.memory_space<vmem>>, vector<1x128xf32>
    %cst_2 = arith.constant 11.3137083 : f32
    %15 = vector.broadcast %cst_2 : f32 to vector<1x128xf32>
    %16 = arith.mulf %14, %15 : vector<1x128xf32>
    %17 = arith.index_cast %c1_i32 : i32 to index
    %c0_3 = arith.constant 0 : index
    %18 = vector.load %arg3[%17, %c0_3] : memref<8x128xf32, #tpu.memory_space<vmem>>, vector<1x128xf32>
    tpu.vector_store %arg3[%17, %c0_3], %16 {strides = array<i32>} : memref<8x128xf32, #tpu.memory_space<vmem>>, vector<1x128xf32>,
    %c2_i32 = arith.constant 2 : i32
    %19 = arith.addi %0, %c2_i32 : i32
    %20 = arith.index_cast %19 : i32 to index
    %21 = memref.load %arg1[%20] : memref<16xi32, #tpu.memory_space<smem>>
    %22 = arith.index_cast %21 : i32 to index
    %c0_4 = arith.constant 0 : index
    %23 = vector.load %arg2[%22, %c0_4] : memref<64x128xf32, #tpu.memory_space<vmem>>, vector<1x128xf32>
    %cst_5 = arith.constant 11.3137083 : f32
    %24 = vector.broadcast %cst_5 : f32 to vector<1x128xf32>
    %25 = arith.mulf %23, %24 : vector<1x128xf32>
    %26 = arith.index_cast %c2_i32 : i32 to index
    %c0_6 = arith.constant 0 : index
    %27 = vector.load %arg3[%26, %c0_6] : memref<8x128xf32, #tpu.memory_space<vmem>>, vector<1x128xf32>
    tpu.vector_store %arg3[%26, %c0_6], %25 {strides = array<i32>} : memref<8x128xf32, #tpu.memory_space<vmem>>, vector<1x128xf32>,
    %c3_i32 = arith.constant 3 : i32
    %28 = arith.addi %0, %c3_i32 : i32
    %29 = arith.index_cast %28 : i32 to index
    %30 = memref.load %arg1[%29] : memref<16xi32, #tpu.memory_space<smem>>
    %31 = arith.index_cast %30 : i32 to index
    %c0_7 = arith.constant 0 : index
    %32 = vector.load %arg2[%31, %c0_7] : memref<64x128xf32, #tpu.memory_space<vmem>>, vector<1x128xf32>
    %cst_8 = arith.constant 11.3137083 : f32
    %33 = vector.broadcast %cst_8 : f32 to vector<1x128xf32>
    %34 = arith.mulf %32, %33 : vector<1x128xf32>
    %35 = arith.index_cast %c3_i32 : i32 to index
    %c0_9 = arith.constant 0 : index
    %36 = vector.load %arg3[%35, %c0_9] : memref<8x128xf32, #tpu.memory_space<vmem>>, vector<1x128xf32>
    tpu.vector_store %arg3[%35, %c0_9], %34 {strides = array<i32>} : memref<8x128xf32, #tpu.memory_space<vmem>>, vector<1x128xf32>,
    %c4_i32 = arith.constant 4 : i32
    %37 = arith.addi %0, %c4_i32 : i32
    %38 = arith.index_cast %37 : i32 to index
    %39 = memref.load %arg1[%38] : memref<16xi32, #tpu.memory_space<smem>>
    %40 = arith.index_cast %39 : i32 to index
    %c0_10 = arith.constant 0 : index
    %41 = vector.load %arg2[%40, %c0_10] : memref<64x128xf32, #tpu.memory_space<vmem>>, vector<1x128xf32>
    %cst_11 = arith.constant 11.3137083 : f32
    %42 = vector.broadcast %cst_11 : f32 to vector<1x128xf32>
    %43 = arith.mulf %41, %42 : vector<1x128xf32>
    %44 = arith.index_cast %c4_i32 : i32 to index
    %c0_12 = arith.constant 0 : index
    %45 = vector.load %arg3[%44, %c0_12] : memref<8x128xf32, #tpu.memory_space<vmem>>, vector<1x128xf32>
    tpu.vector_store %arg3[%44, %c0_12], %43 {strides = array<i32>} : memref<8x128xf32, #tpu.memory_space<vmem>>, vector<1x128xf32>,
    %c5_i32 = arith.constant 5 : i32
    %46 = arith.addi %0, %c5_i32 : i32
    %47 = arith.index_cast %46 : i32 to index
    %48 = memref.load %arg1[%47] : memref<16xi32, #tpu.memory_space<smem>>
    %49 = arith.index_cast %48 : i32 to index
    %c0_13 = arith.constant 0 : index
    %50 = vector.load %arg2[%49, %c0_13] : memref<64x128xf32, #tpu.memory_space<vmem>>, vector<1x128xf32>
    %cst_14 = arith.constant 11.3137083 : f32
    %51 = vector.broadcast %cst_14 : f32 to vector<1x128xf32>
    %52 = arith.mulf %50, %51 : vector<1x128xf32>
    %53 = arith.index_cast %c5_i32 : i32 to index
    %c0_15 = arith.constant 0 : index
    %54 = vector.load %arg3[%53, %c0_15] : memref<8x128xf32, #tpu.memory_space<vmem>>, vector<1x128xf32>
    tpu.vector_store %arg3[%53, %c0_15], %52 {strides = array<i32>} : memref<8x128xf32, #tpu.memory_space<vmem>>, vector<1x128xf32>,
    %c6_i32 = arith.constant 6 : i32
    %55 = arith.addi %0, %c6_i32 : i32
    %56 = arith.index_cast %55 : i32 to index
    %57 = memref.load %arg1[%56] : memref<16xi32, #tpu.memory_space<smem>>
    %58 = arith.index_cast %57 : i32 to index
    %c0_16 = arith.constant 0 : index
    %59 = vector.load %arg2[%58, %c0_16] : memref<64x128xf32, #tpu.memory_space<vmem>>, vector<1x128xf32>
    %cst_17 = arith.constant 11.3137083 : f32
    %60 = vector.broadcast %cst_17 : f32 to vector<1x128xf32>
    %61 = arith.mulf %59, %60 : vector<1x128xf32>
    %62 = arith.index_cast %c6_i32 : i32 to index
    %c0_18 = arith.constant 0 : index
    %63 = vector.load %arg3[%62, %c0_18] : memref<8x128xf32, #tpu.memory_space<vmem>>, vector<1x128xf32>
    tpu.vector_store %arg3[%62, %c0_18], %61 {strides = array<i32>} : memref<8x128xf32, #tpu.memory_space<vmem>>, vector<1x128xf32>,
    %c7_i32 = arith.constant 7 : i32
    %64 = arith.addi %0, %c7_i32 : i32
    %65 = arith.index_cast %64 : i32 to index
    %66 = memref.load %arg1[%65] : memref<16xi32, #tpu.memory_space<smem>>
    %67 = arith.index_cast %66 : i32 to index
    %c0_19 = arith.constant 0 : index
    %68 = vector.load %arg2[%67, %c0_19] : memref<64x128xf32, #tpu.memory_space<vmem>>, vector<1x128xf32>
    %cst_20 = arith.constant 11.3137083 : f32
    %69 = vector.broadcast %cst_20 : f32 to vector<1x128xf32>
    %70 = arith.mulf %68, %69 : vector<1x128xf32>
    %71 = arith.index_cast %c7_i32 : i32 to index
    %c0_21 = arith.constant 0 : index
    %72 = vector.load %arg3[%71, %c0_21] : memref<8x128xf32, #tpu.memory_space<vmem>>, vector<1x128xf32>
    tpu.vector_store %arg3[%71, %c0_21], %70 {strides = array<i32>} : memref<8x128xf32, #tpu.memory_space<vmem>>, vector<1x128xf32>,
    %c8_i32_22 = arith.constant 8 : i32
    return
  }
  func.func @transform_0(%arg0: i32, %arg1: memref<16xi32, #tpu.memory_space<smem>>) -> (i32, i32) {
    %c0_i32 = arith.constant 0 : i32
    %c0_i32_0 = arith.constant 0 : i32
    %c0_i32_1 = arith.constant 0 : i32
    return %c0_i32, %c0_i32_0 : i32, i32
  }
  func.func @transform_1(%arg0: i32, %arg1: memref<16xi32, #tpu.memory_space<smem>>) -> (i32, i32) {
    %c0_i32 = arith.constant 0 : i32
    %c0_i32_0 = arith.constant 0 : i32
    return %arg0, %c0_i32 : i32, i32
  }
}

</mosaic_0001>

<bundles_post_ra>
// kernel: tpu_custom_call.1
= control target key start
LH: loop header
LB: loop body
LE: loop exit
PB: predicated region body
PF: predicated region fallthrough
CT: control target
= control target key end

     0   :  { %s428_s12 = smov [#allocation3]   ;;  %s569_s0 = inlined_call_operand.hbm [shape: s32[16], index: 0, kind: input, shape index: {}]   ;;  %s570_s1 = inlined_call_operand.hbm [shape: f32[64,128], index: 1, kind: input, shape index: {}]   ;;  %s571_s2 = inlined_call_operand.hbm [shape: f32[16,128], index: 2, kind: output, shape index: {}]  }
   0x1   :  { %s8_s11 = sshll.u32 %s569_s0, 4  ;;  %s9_s11 = int_to_ptr.hbm [resolvable:$true] %s8_s11 }
   0x2   :  { %11 = dma.hbm_to_smem %s9_s11, 16, %s428_s12, [#allocation2] }
   0x3   :  { %402 = dma.done.wait [#allocation2], 16 }
   0x4   :  { %403 = vsyncadd [#allocation2], 4294967280 }
   0x5   :  { %14 = sfence }
   0x6   :  { %15 = vsyncpa [#allocation5], 0 }
   0x7   :  { %16 = vsyncpa [#allocation6], 0 }
   0x8   :  { %18 = vsyncpa [#allocation6 + $0x1], 0  ;;  %s450_s13 = smov 0   ;;  %s452_s14 = smov 0  }
   0x9   :  { %s454_s15 = smov 0   ;;  %s456_s16 = smov 0  }
   0xa LB: > { %s471_s0 = sadd.s32 4294967295, %s426_s16   ;;  %s252_s17 = sadd.s32 4294967294, %s426_s16   ;;  %s426_s16 = sphi %s456_s16, %s577_s16   ;;  %s422_s15 = sphi %s454_s15, %s576_s15   ;;  %s418_s14 = sphi %s452_s14, %s575_s14   ;;  %s414_s13 = sphi %s450_s13, %s574_s13  }
   0xb   : > { %s475_s18 = sadd.s32 1, %s426_s16   ;;  %s52_s19 = sadd.s32 1, %s422_s15 }
   0xc   : > { %s49_s20 = ssub.s32 %s426_s16, %s475_s18  ;;  %p62_p0 = scmp.ne.s32.totalorder %s422_s15, %s418_s14 }
   0xd   : > { %p50_p1 = scmp.eq.s32.totalorder %s49_s20, 0  ;;  %p63_p2 = scmp.eq.s32.totalorder %s471_s0, 1 }
   0xe   : > { %p68_p3 = scmp.ne.s32.totalorder %s418_s14, %s414_s13  ;;  %p69_p4 = scmp.eq.s32.totalorder %s252_s17, 1 }
   0xf   : > { %s486_s21 = scalar_select %p50_p1, %s422_s15, %s52_s19  }
  0x10   : > { %p488_p5 = por %p63_p2, %p62_p0  ;;  %p492_p6 = por %p69_p4, %p68_p3 }
  0x11   : > { %p253_p7 = scmp.ge.s32.totalorder %s426_s16, 1  ;;  %p76_p8 = scmp.lt.s32.totalorder %s426_s16, 3 }
  0x12   : > { %p277_p9 = scmp.eq.s32.totalorder %s471_s0, 0  ;;  %s87_s26 = sshll.u32 %s570_s1, 4  ;;  %s88_s26 = int_to_ptr.hbm [resolvable:$true] %s87_s26 }
  0x13   : > { %p77_p10 = pnand %p253_p7, %p76_p8  ;;  %s429_s27 = smov [#allocation4]  }
  0x14   : > { %s89_s28 = sshll.u32 %s429_s27, 4  ;;  %s430_s29 = smov 128   ;;  %s90_s28 = int_to_ptr.vmem [resolvable:$true] %s89_s28 }
  0x15   : > { %p269_p11 = pneg %p77_p10  ;;  %s431_s30 = smov 8  }
  0x16   : > { %105 = sbr.rel (%p77_p10) target bundleno = 58 (0x3a), region = 24 }
  0x17   : > { %p270_p12 = pnand %p277_p9, %p269_p11 }
  0x19   : > { %272 = dma.hbm_to_vmem [thread:$0]  (!%p270_p12), %s88_s26, 1024, %s90_s28, [#allocation5], %s430_s29, %s430_s29, %s431_s30  }
  0x1b   : > { %405 = dma.done.wait (%p277_p9), [#allocation5], 1024  }
  0x1c   : > { %407 = vsyncadd (%p277_p9), [#allocation5], 4294966272  ;;  %s118_s3 = sand.u32 1, %s418_s14   ;;  %s510_s4 = sshll.u32 %s471_s0, 3 }
  0x1d   : > { %s257_s5 = sshll.u32 %s118_s3, 3  ;;  %s122_s6 = sld [smem:[#allocation3 + %s510_s4]] }
  0x1e   : > { %s127_s7 = sadd.s32 1, %s510_s4  ;;  %s133_s8 = sadd.s32 2, %s510_s4 }
  0x1f   : > { %s128_s9 = sld [smem:[#allocation3 + %s127_s7]]  ;;  %s139_s10 = sadd.s32 3, %s510_s4 }
  0x20   : > { %s134_s11 = sld [smem:[#allocation3 + %s133_s8]]  ;;  %s145_s12 = sadd.s32 4, %s510_s4 }
  0x21   : > { %s140_s17 = sld [smem:[#allocation3 + %s139_s10]]  ;;  %s151_s0 = sadd.s32 5, %s510_s4 }
  0x22   : > { %s146_s19 = sld [smem:[#allocation3 + %s145_s12]]  ;;  %s157_s25 = sadd.s32 6, %s510_s4 }
  0x23   : > { %s123_s20 = scalar_lea.vmem [#allocation4], %s122_s6  ;;  %s152_s24 = sld [smem:[#allocation3 + %s151_s0]] }
  0x24   : > { %v124_v0 = vld [vmem:[%s123_s20] sm:$0x1]  ;;  %s158_s26 = sld [smem:[#allocation3 + %s157_s25]]  ;;  %s163_s27 = sadd.s32 7, %s510_s4 }
  0x25   : > { %v125_v1 = vmul.f32 11.313708, %v124_v0  ;;  %s522_s28 = sld [smem:[#allocation3 + %s163_s27]]  ;;  %s524_s29 = scalar_lea.vmem [#allocation7], %s257_s5 }
  0x26   : > { %s129_s30 = scalar_lea.vmem [#allocation4], %s128_s9  ;;  %s135_s6 = scalar_lea.vmem [#allocation4], %s134_s11 }
  0x27   : > { %126 = vst [vmem:[%s524_s29] sm:$0x1] %v125_v1  ;;  %v130_v2 = vld [vmem:[%s129_s30] sm:$0x1]  ;;  %s141_s7 = scalar_lea.vmem [#allocation4], %s140_s17  ;;  %s182_s8 = sshll.u32 %s524_s29, 4  ;;  %s183_s8 = int_to_ptr.vmem [resolvable:$true] %s182_s8 }
  0x28   : > { %v131_v3 = vmul.f32 11.313708, %v130_v2  ;;  %v136_v4 = vld [vmem:[%s135_s6] sm:$0x1]  ;;  %s147_s5 = scalar_lea.vmem [#allocation4], %s146_s19  ;;  %s180_s9 = scalar_lea.hbm %s571_s2, %s510_s4 }
  0x29   : > { %v137_v5 = vmul.f32 11.313708, %v136_v4  ;;  %v142_v6 = vld [vmem:[%s141_s7] sm:$0x1]  ;;  %s153_s11 = scalar_lea.vmem [#allocation4], %s152_s24  ;;  %s184_s0 = sshll.u32 %s180_s9, 4  ;;  %s185_s0 = int_to_ptr.hbm [resolvable:$true] %s184_s0 }
  0x2a   : > { %132 = vst [vmem:[%s524_s29 + $0x1] sm:$0x1] %v131_v3  ;;  %v143_v7 = vmul.f32 11.313708, %v142_v6  ;;  %v148_v8 = vld [vmem:[%s147_s5] sm:$0x1] }
  0x2b   : > { %138 = vst [vmem:[%s524_s29 + $0x2] sm:$0x1] %v137_v5  ;;  %v149_v9 = vmul.f32 11.313708, %v148_v8  ;;  %v154_v10 = vld [vmem:[%s153_s11] sm:$0x1] }
  0x2c   : > { %144 = vst [vmem:[%s524_s29 + $0x3] sm:$0x1] %v143_v7  ;;  %s159_s17 = scalar_lea.vmem [#allocation4], %s158_s26  ;;  %v155_v12 = vmul.f32 11.313708, %v154_v10  ;;  %s165_s19 = scalar_lea.vmem [#allocation4], %s522_s28 }
  0x2d   : > { %v160_v11 = vld [vmem:[%s159_s17] sm:$0x1]  ;;  %150 = vst [vmem:[%s524_s29 + $0x4] sm:$0x1] %v149_v9  ;;  %s170_s4 = scalar_lea.sflag [#allocation6], %s118_s3  ;;  %s372_s20 = sshra.s32 %s185_s0, 4  ;;  %s373_s20 = int_to_ptr.hbm [resolvable:$true] %s372_s20 }
  0x2e   : > { %v161_v13 = vmul.f32 11.313708, %v160_v11  ;;  %156 = vst [vmem:[%s524_s29 + $0x5] sm:$0x1] %v155_v12  ;;  %v166_v14 = vld [vmem:[%s165_s19] sm:$0x1]  ;;  %p379_p2 = scmp.lt.s32.totalorder %s373_s20, %s571_s2 }
  0x2f   : > { %v167_v15 = vmul.f32 11.313708, %v166_v14  ;;  %s374_s24 = scalar_lea.hbm %s373_s20, 8  ;;  %s378_s27 = scalar_lea.hbm %s571_s2, 16 }
  0x30   : > { %162 = vst [vmem:[%s524_s29 + $0x6] sm:$0x1] %v161_v13  ;;  %p375_p13 = scmp.ne.s32.totalorder %s373_s20, %s374_s24  ;;  %p380_p3 = scmp.lt.s32.totalorder %s378_s27, %s374_s24 }
  0x31   : > { %168 = vst [vmem:[%s524_s29 + $0x7] sm:$0x1] %v167_v15 }
  0x32   : > { %p376_p0 = pnand %p375_p13, %p488_p5  ;;  %p381_p4 = por %p380_p3, %p379_p2 }
  0x34   : > { %p377_p1 = pneg %p376_p0 }
  0x36   : > { %p382_p7 = pnand %p381_p4, %p377_p1 }
  0x38   : > { %385 = shalt.err (!%p382_p7)
}
  0x39   : > { %267 = dma.vmem_to_hbm [thread:$0]  (%p488_p5), %s183_s8, 128, %s185_s0, %s170_s4  }
  0x3a PF: > { %p279_p8 = scmp.ge.s32.totalorder %s426_s16, 2  ;;  %s196_s3 = sand.u32 1, %s414_s13  }
  0x3b   : > { %s197_s29 = scalar_lea.sflag [#allocation6], %s196_s3 }
  0x3c   : > { %p274_p9 = pnand %p279_p8, %p492_p6 }
  0x3e   : > { %p275_p10 = pneg %p274_p9 }
  0x40   : > { %409 = dma.done.wait (%p275_p10), %s197_s29, 128  }
  0x41   : > { %411 = vsyncadd (%p275_p10), %s197_s29, 4294967168  ;;  %p21_p11 = scmp.ge.s32.totalorder %s475_s18, 4   ;;  %s574_s13 = smov %s418_s14 }
  0x42   : > { %s575_s14 = smov %s422_s15  ;;  %s576_s15 = smov %s486_s21 }
  0x43   : > { %s577_s16 = smov %s475_s18  ;;  %23 = sbr.rel (!%p21_p11) target bundleno = 10 (0xa), region = 69 }
  0x48   :  { %203 = vsyncpa [#allocation5], 1 }
  0x49   :  { %205 = vsyncpa [#allocation5 + $0x1], 1 }
  0x4a   :  { %206 = vsyncpa [#allocation6], 1 }
  0x4b   :  { %208 = vsyncpa [#allocation6 + $0x1], 1 }

</bundles_post_ra>
